<compile_context>
chip_gen: v7x
topology: tpu7x:2x2x1
jax: 0.10.0
libtpu: 0.0.40
codegen_flags: <defaults>
</compile_context>

<pallas_src>
import functools

import jax
import jax.numpy as jnp
from jax.experimental import pallas as pl
from jax.experimental.pallas import tpu as pltpu


_SUBLANE = 8          # sublane alignment for the batch tile
_MAX_BATCH_TILE = 256  # upper bound on rows per grid step
_CLASS_PAD = 128      # pad num_classes to a full lane width for dense stores


def _first_nn_kernel(idx_ref, table_ref, w1_ref, b1_ref, w2_ref, b2_ref,
                     out_ref):
    # idx_ref:   [TB, S]   int32   token ids for this batch tile
    # table_ref: [V, D]    bf16    embedding table
    # w1_ref:    [D, H]    bf16    layer1.weight.T
    # b1_ref:    [1, H]    f32
    # w2_ref:    [H, 128]  bf16    layer2.weight.T, zero-padded classes
    # b2_ref:    [1, 128]  f32     zero-padded
    # out_ref:   [TB, 128] f32
    idx = idx_ref[...]                                   # [TB, S]
    tb, bag_len = idx.shape
    vocab = table_ref.shape[0]

    # ---- EmbeddingBag(mode='mean') as one counts @ table matmul ----
    # Per-bag token-count matrix, accumulated in f32 on the VPU (S trivial
    # compare passes over [TB, V]); a single cast to bf16 feeds the MXU.
    vocab_iota = jax.lax.broadcasted_iota(jnp.int32, (tb, vocab), 1)
    counts = jnp.zeros((tb, vocab), jnp.float32)
    for s in range(bag_len):                             # static unroll, S small
        counts = counts + (idx[:, s:s + 1] == vocab_iota).astype(jnp.float32)
    bag_sum = jnp.dot(counts.astype(table_ref.dtype), table_ref[...],
                      preferred_element_type=jnp.float32)    # [TB, D]
    emb = bag_sum * jnp.float32(1.0 / bag_len)               # mean in f32

    # ---- layer1 + ReLU (bias / ReLU in f32) ----
    h = jnp.dot(emb.astype(w1_ref.dtype), w1_ref[...],
                preferred_element_type=jnp.float32)          # [TB, H]
    h = jnp.maximum(h + b1_ref[...], 0.0)

    # ---- layer2 (lane-dense padded output) ----
    out_ref[...] = jnp.dot(h.astype(w2_ref.dtype), w2_ref[...],
                           preferred_element_type=jnp.float32) + b2_ref[...]


def prepare_params(embed_table, w1, b1, w2, b2):
    """One-time weight prep (transpose / cast / pad) outside the per-call path."""
    num_classes, hidden = w2.shape
    w2_t = jnp.zeros((hidden, _CLASS_PAD), jnp.bfloat16)
    w2_t = w2_t.at[:, :num_classes].set(jnp.transpose(w2).astype(jnp.bfloat16))
    b2_p = jnp.zeros((1, _CLASS_PAD), jnp.float32)
    b2_p = b2_p.at[:, :num_classes].set(b2.astype(jnp.float32).reshape(1, -1))
    params = (
        embed_table.astype(jnp.bfloat16),           # [V, D]
        jnp.transpose(w1).astype(jnp.bfloat16),     # [D, H]
        b1.astype(jnp.float32).reshape(1, -1),      # [1, H]
        w2_t,                                       # [H, 128]
        b2_p,                                       # [1, 128]
    )
    return params, num_classes


def _choose_tile(batch):
    """Batch tile: as large as possible (<=256) while keeping >=2 grid steps
    when the batch allows it, so v7x's two TensorCores both get work."""
    padded = -(-batch // _SUBLANE) * _SUBLANE
    tile = min(_MAX_BATCH_TILE,
               max(_SUBLANE, (padded // 2 // _SUBLANE) * _SUBLANE))
    padded_batch = -(-padded // tile) * tile
    return tile, padded_batch


def _vmem_limit_bytes(tile, bag_len, vocab, dim, hidden):
    """Rough resident-VMEM estimate (default double-buffering on every input)
    with headroom, clamped so the limit is valid on v7x's 64 MiB VMEM while
    leaving v5e/v6e's 128 MiB available for larger tables if scaled up."""
    f32, bf16, i32 = 4, 2, 4
    resident = (
        2 * vocab * dim * bf16                        # table buffers
        + 2 * dim * hidden * bf16                     # w1 buffers
        + 2 * hidden * _CLASS_PAD * bf16              # w2 buffers
        + 2 * (hidden + _CLASS_PAD) * f32             # biases
        + 2 * tile * bag_len * i32                    # idx tile buffers
        + 2 * tile * _CLASS_PAD * f32                 # out tile buffers
        + tile * vocab * f32                          # counts intermediate
        + tile * (dim + hidden) * f32                 # emb / h intermediates
    )
    return int(min(48 * 1024 * 1024, max(4 * 1024 * 1024, 4 * resident)))


@functools.partial(jax.jit, static_argnames=("num_classes",))
def first_neural_network_apply(params, data_input, num_classes):
    """Forward pass matching FirstNeuralNetwork.forward semantics."""
    table, w1, b1, w2, b2 = params
    batch, bag_len = data_input.shape
    vocab, dim = table.shape
    hidden = w1.shape[1]

    tile, padded_batch = _choose_tile(batch)

    idx = data_input.astype(jnp.int32)
    if padded_batch != batch:
        # Padded rows use token 0; they are sliced off after the call.
        idx = jnp.pad(idx, ((0, padded_batch - batch), (0, 0)))

    out = pl.pallas_call(
        _first_nn_kernel,
        out_shape=jax.ShapeDtypeStruct((padded_batch, _CLASS_PAD), jnp.float32),
        grid=(padded_batch // tile,),
        in_specs=[
            pl.BlockSpec((tile, bag_len), lambda i: (i, 0)),  # idx tile [TB, S]
            pl.BlockSpec(table.shape, lambda i: (0, 0)),      # full table
            pl.BlockSpec(w1.shape, lambda i: (0, 0)),
            pl.BlockSpec(b1.shape, lambda i: (0, 0)),
            pl.BlockSpec(w2.shape, lambda i: (0, 0)),
            pl.BlockSpec(b2.shape, lambda i: (0, 0)),
        ],
        out_specs=pl.BlockSpec((tile, _CLASS_PAD), lambda i: (i, 0)),
        compiler_params=pltpu.CompilerParams(
            dimension_semantics=("parallel",),
            vmem_limit_bytes=_vmem_limit_bytes(tile, bag_len, vocab, dim,
                                               hidden),
        ),
    )(idx, table, w1, b1, w2, b2)

    logits = out[:batch, :num_classes]
    # Mirrors output_layer2.squeeze() (drops the batch dim too when batch==1).
    return jnp.squeeze(logits)


if __name__ == "__main__":
    # Small deterministic setup consistent with the module:
    #   vocab V=128, embed/input_size D=32, hidden H=32, num_classes C=3,
    #   batch B=8, bag length S=8.
    V, D, H, C = 128, 32, 32, 3
    B, S = 8, 8

    key = jax.random.PRNGKey(0)
    k_tab, k_w1, k_b1, k_w2, k_b2, k_idx = jax.random.split(key, 6)

    embed_table = jax.random.normal(k_tab, (V, D), dtype=jnp.float32)
    w1 = jax.random.normal(k_w1, (H, D), dtype=jnp.float32) * 0.1
    b1 = jax.random.normal(k_b1, (H,), dtype=jnp.float32) * 0.1
    w2 = jax.random.normal(k_w2, (C, H), dtype=jnp.float32) * 0.1
    b2 = jax.random.normal(k_b2, (C,), dtype=jnp.float32) * 0.1
    data_input = jax.random.randint(k_idx, (B, S), 0, V, dtype=jnp.int32)

    params, num_classes = prepare_params(embed_table, w1, b1, w2, b2)
    out = first_neural_network_apply(params, data_input, num_classes)
    out = jax.block_until_ready(out)

    # Pure-JAX reference applying the same bf16 operand rounding the kernel
    # uses (f32 accumulation, f32 mean / biases / ReLU).
    tab_bf = embed_table.astype(jnp.bfloat16).astype(jnp.float32)
    w1t_bf = jnp.transpose(w1).astype(jnp.bfloat16).astype(jnp.float32)
    w2t_bf = jnp.transpose(w2).astype(jnp.bfloat16).astype(jnp.float32)
    emb_ref = jnp.mean(tab_bf[data_input], axis=1)                      # [B, D]
    h_ref = jnp.maximum(
        emb_ref.astype(jnp.bfloat16).astype(jnp.float32) @ w1t_bf + b1, 0.0)
    ref = jnp.squeeze(
        h_ref.astype(jnp.bfloat16).astype(jnp.float32) @ w2t_bf + b2)   # [B, C]

    assert out.shape == ref.shape, (out.shape, ref.shape)
    assert jnp.allclose(out, ref, atol=5e-3, rtol=5e-3), \
        float(jnp.max(jnp.abs(out - ref)))

    print("KERNEL_OK")
</pallas_src>

<mosaic_0001>
module attributes {stable_mosaic.version = 11 : i64} {
  func.func @_first_nn_kernel(%arg0: i32, %arg1: memref<8x8xi32, #tpu.memory_space<vmem>>, %arg2: memref<128x32xbf16, #tpu.memory_space<vmem>>, %arg3: memref<32x32xbf16, #tpu.memory_space<vmem>>, %arg4: memref<1x32xf32, #tpu.memory_space<vmem>>, %arg5: memref<32x128xbf16, #tpu.memory_space<vmem>>, %arg6: memref<1x128xf32, #tpu.memory_space<vmem>>, %arg7: memref<8x128xf32, #tpu.memory_space<vmem>>) attributes {dimension_semantics = [#tpu.dimension_semantics<parallel>], iteration_bounds = array<i64: 1>, scalar_prefetch = 0 : i64, scratch_operands = 0 : i64, tpu.core_type = #tpu.core_type<tc>, window_params = [{transform_indices = @transform_0, window_bounds = array<i64: 8, 8>}, {pipeline_mode = #tpu.pipeline_mode<synchronous>, transform_indices = @transform_1, window_bounds = array<i64: 128, 32>}, {pipeline_mode = #tpu.pipeline_mode<synchronous>, transform_indices = @transform_2, window_bounds = array<i64: 32, 32>}, {pipeline_mode = #tpu.pipeline_mode<synchronous>, transform_indices = @transform_3, window_bounds = array<i64: 1, 32>}, {pipeline_mode = #tpu.pipeline_mode<synchronous>, transform_indices = @transform_4, window_bounds = array<i64: 32, 128>}, {pipeline_mode = #tpu.pipeline_mode<synchronous>, transform_indices = @transform_5, window_bounds = array<i64: 1, 128>}, {transform_indices = @transform_6, window_bounds = array<i64: 8, 128>}]} {
    %c0 = arith.constant 0 : index
    %c0_0 = arith.constant 0 : index
    %0 = vector.load %arg1[%c0, %c0_0] : memref<8x8xi32, #tpu.memory_space<vmem>>, vector<8x8xi32>
    %1 = tpu.iota {dimensions = array<i32: 1>} : vector<8x128xi32>
    %cst = arith.constant 0.000000e+00 : f32
    %2 = vector.broadcast %cst : f32 to vector<8x128xf32>
    %3 = vector.extract_strided_slice %0 {offsets = [0, 0], sizes = [8, 1], strides = [1, 1]} : vector<8x8xi32> to vector<8x1xi32>
    %4 = vector.broadcast %3 : vector<8x1xi32> to vector<8x128xi32>
    %5 = arith.cmpi eq, %4, %1 : vector<8x128xi32>
    %6 = arith.extui %5 : vector<8x128xi1> to vector<8x128xi32>
    %7 = arith.sitofp %6 : vector<8x128xi32> to vector<8x128xf32>
    %8 = arith.addf %2, %7 : vector<8x128xf32>
    %9 = vector.extract_strided_slice %0 {offsets = [0, 1], sizes = [8, 1], strides = [1, 1]} : vector<8x8xi32> to vector<8x1xi32>
    %10 = vector.broadcast %9 : vector<8x1xi32> to vector<8x128xi32>
    %11 = arith.cmpi eq, %10, %1 : vector<8x128xi32>
    %12 = arith.extui %11 : vector<8x128xi1> to vector<8x128xi32>
    %13 = arith.sitofp %12 : vector<8x128xi32> to vector<8x128xf32>
    %14 = arith.addf %8, %13 : vector<8x128xf32>
    %15 = vector.extract_strided_slice %0 {offsets = [0, 2], sizes = [8, 1], strides = [1, 1]} : vector<8x8xi32> to vector<8x1xi32>
    %16 = vector.broadcast %15 : vector<8x1xi32> to vector<8x128xi32>
    %17 = arith.cmpi eq, %16, %1 : vector<8x128xi32>
    %18 = arith.extui %17 : vector<8x128xi1> to vector<8x128xi32>
    %19 = arith.sitofp %18 : vector<8x128xi32> to vector<8x128xf32>
    %20 = arith.addf %14, %19 : vector<8x128xf32>
    %21 = vector.extract_strided_slice %0 {offsets = [0, 3], sizes = [8, 1], strides = [1, 1]} : vector<8x8xi32> to vector<8x1xi32>
    %22 = vector.broadcast %21 : vector<8x1xi32> to vector<8x128xi32>
    %23 = arith.cmpi eq, %22, %1 : vector<8x128xi32>
    %24 = arith.extui %23 : vector<8x128xi1> to vector<8x128xi32>
    %25 = arith.sitofp %24 : vector<8x128xi32> to vector<8x128xf32>
    %26 = arith.addf %20, %25 : vector<8x128xf32>
    %27 = vector.extract_strided_slice %0 {offsets = [0, 4], sizes = [8, 1], strides = [1, 1]} : vector<8x8xi32> to vector<8x1xi32>
    %28 = vector.broadcast %27 : vector<8x1xi32> to vector<8x128xi32>
    %29 = arith.cmpi eq, %28, %1 : vector<8x128xi32>
    %30 = arith.extui %29 : vector<8x128xi1> to vector<8x128xi32>
    %31 = arith.sitofp %30 : vector<8x128xi32> to vector<8x128xf32>
    %32 = arith.addf %26, %31 : vector<8x128xf32>
    %33 = vector.extract_strided_slice %0 {offsets = [0, 5], sizes = [8, 1], strides = [1, 1]} : vector<8x8xi32> to vector<8x1xi32>
    %34 = vector.broadcast %33 : vector<8x1xi32> to vector<8x128xi32>
    %35 = arith.cmpi eq, %34, %1 : vector<8x128xi32>
    %36 = arith.extui %35 : vector<8x128xi1> to vector<8x128xi32>
    %37 = arith.sitofp %36 : vector<8x128xi32> to vector<8x128xf32>
    %38 = arith.addf %32, %37 : vector<8x128xf32>
    %39 = vector.extract_strided_slice %0 {offsets = [0, 6], sizes = [8, 1], strides = [1, 1]} : vector<8x8xi32> to vector<8x1xi32>
    %40 = vector.broadcast %39 : vector<8x1xi32> to vector<8x128xi32>
    %41 = arith.cmpi eq, %40, %1 : vector<8x128xi32>
    %42 = arith.extui %41 : vector<8x128xi1> to vector<8x128xi32>
    %43 = arith.sitofp %42 : vector<8x128xi32> to vector<8x128xf32>
    %44 = arith.addf %38, %43 : vector<8x128xf32>
    %45 = vector.extract_strided_slice %0 {offsets = [0, 7], sizes = [8, 1], strides = [1, 1]} : vector<8x8xi32> to vector<8x1xi32>
    %46 = vector.broadcast %45 : vector<8x1xi32> to vector<8x128xi32>
    %47 = arith.cmpi eq, %46, %1 : vector<8x128xi32>
    %48 = arith.extui %47 : vector<8x128xi1> to vector<8x128xi32>
    %49 = arith.sitofp %48 : vector<8x128xi32> to vector<8x128xf32>
    %50 = arith.addf %44, %49 : vector<8x128xf32>
    %51 = arith.truncf %50 : vector<8x128xf32> to vector<8x128xbf16>
    %c0_1 = arith.constant 0 : index
    %c0_2 = arith.constant 0 : index
    %52 = vector.load %arg2[%c0_1, %c0_2] : memref<128x32xbf16, #tpu.memory_space<vmem>>, vector<128x32xbf16>
    %cst_3 = arith.constant dense<0.000000e+00> : vector<8x32xf32>
    %53 = tpu.matmul %51, %52, %cst_3 {dimension_numbers = #tpu.dot_dimension_numbers<[1], [0], [0], [1], [0, 0, 1, 1], [], []>} : vector<8x128xbf16>, vector<128x32xbf16>, vector<8x32xf32> -> vector<8x32xf32>
    %cst_4 = arith.constant 1.250000e-01 : f32
    %54 = vector.broadcast %cst_4 : f32 to vector<8x32xf32>
    %55 = arith.mulf %53, %54 : vector<8x32xf32>
    %56 = arith.truncf %55 : vector<8x32xf32> to vector<8x32xbf16>
    %c0_5 = arith.constant 0 : index
    %c0_6 = arith.constant 0 : index
    %57 = vector.load %arg3[%c0_5, %c0_6] : memref<32x32xbf16, #tpu.memory_space<vmem>>, vector<32x32xbf16>
    %cst_7 = arith.constant dense<0.000000e+00> : vector<8x32xf32>
    %58 = tpu.matmul %56, %57, %cst_7 {dimension_numbers = #tpu.dot_dimension_numbers<[1], [0], [0], [1], [0, 0, 1, 1], [], []>} : vector<8x32xbf16>, vector<32x32xbf16>, vector<8x32xf32> -> vector<8x32xf32>
    %c0_8 = arith.constant 0 : index
    %c0_9 = arith.constant 0 : index
    %59 = vector.load %arg4[%c0_8, %c0_9] : memref<1x32xf32, #tpu.memory_space<vmem>>, vector<1x32xf32>
    %60 = vector.broadcast %59 : vector<1x32xf32> to vector<8x32xf32>
    %61 = arith.addf %58, %60 : vector<8x32xf32>
    %cst_10 = arith.constant 0.000000e+00 : f32
    %62 = vector.broadcast %cst_10 : f32 to vector<8x32xf32>
    %63 = arith.maximumf %61, %62 : vector<8x32xf32>
    %64 = arith.truncf %63 : vector<8x32xf32> to vector<8x32xbf16>
    %c0_11 = arith.constant 0 : index
    %c0_12 = arith.constant 0 : index
    %65 = vector.load %arg5[%c0_11, %c0_12] : memref<32x128xbf16, #tpu.memory_space<vmem>>, vector<32x128xbf16>
    %cst_13 = arith.constant dense<0.000000e+00> : vector<8x128xf32>
    %66 = tpu.matmul %64, %65, %cst_13 {dimension_numbers = #tpu.dot_dimension_numbers<[1], [0], [0], [1], [0, 0, 1, 1], [], []>} : vector<8x32xbf16>, vector<32x128xbf16>, vector<8x128xf32> -> vector<8x128xf32>
    %c0_14 = arith.constant 0 : index
    %c0_15 = arith.constant 0 : index
    %67 = vector.load %arg6[%c0_14, %c0_15] : memref<1x128xf32, #tpu.memory_space<vmem>>, vector<1x128xf32>
    %68 = vector.broadcast %67 : vector<1x128xf32> to vector<8x128xf32>
    %69 = arith.addf %66, %68 : vector<8x128xf32>
    %c0_16 = arith.constant 0 : index
    %c0_17 = arith.constant 0 : index
    %70 = vector.load %arg7[%c0_16, %c0_17] : memref<8x128xf32, #tpu.memory_space<vmem>>, vector<8x128xf32>
    tpu.vector_store %arg7[%c0_16, %c0_17], %69 {strides = array<i32>} : memref<8x128xf32, #tpu.memory_space<vmem>>, vector<8x128xf32>,
    return
  }
  func.func @transform_0(%arg0: i32) -> (i32, i32) {
    %c0_i32 = arith.constant 0 : i32
    %c0_i32_0 = arith.constant 0 : i32
    return %arg0, %c0_i32 : i32, i32
  }
  func.func @transform_1(%arg0: i32) -> (i32, i32) {
    %c0_i32 = arith.constant 0 : i32
    %c0_i32_0 = arith.constant 0 : i32
    %c0_i32_1 = arith.constant 0 : i32
    return %c0_i32, %c0_i32_0 : i32, i32
  }
  func.func @transform_2(%arg0: i32) -> (i32, i32) {
    %c0_i32 = arith.constant 0 : i32
    %c0_i32_0 = arith.constant 0 : i32
    %c0_i32_1 = arith.constant 0 : i32
    return %c0_i32, %c0_i32_0 : i32, i32
  }
  func.func @transform_3(%arg0: i32) -> (i32, i32) {
    %c0_i32 = arith.constant 0 : i32
    %c0_i32_0 = arith.constant 0 : i32
    %c0_i32_1 = arith.constant 0 : i32
    return %c0_i32, %c0_i32_0 : i32, i32
  }
  func.func @transform_4(%arg0: i32) -> (i32, i32) {
    %c0_i32 = arith.constant 0 : i32
    %c0_i32_0 = arith.constant 0 : i32
    %c0_i32_1 = arith.constant 0 : i32
    return %c0_i32, %c0_i32_0 : i32, i32
  }
  func.func @transform_5(%arg0: i32) -> (i32, i32) {
    %c0_i32 = arith.constant 0 : i32
    %c0_i32_0 = arith.constant 0 : i32
    %c0_i32_1 = arith.constant 0 : i32
    return %c0_i32, %c0_i32_0 : i32, i32
  }
  func.func @transform_6(%arg0: i32) -> (i32, i32) {
    %c0_i32 = arith.constant 0 : i32
    %c0_i32_0 = arith.constant 0 : i32
    return %arg0, %c0_i32 : i32, i32
  }
}

</mosaic_0001>

<bundles_post_ra>
// kernel: first_neural_network_apply.1
= control target key start
LH: loop header
LB: loop body
LE: loop exit
PB: predicated region body
PF: predicated region fallthrough
CT: control target
= control target key end

     0   :  { %v436_v0 = vmov 2   ;;  %v437_v1 = vmov 0   ;;  %v438_v4 = vmov 0.0   ;;  %v439_v6 = vmov 3   ;;  %s557_s0 = inlined_call_operand.vmem [shape: s32[8,8], index: 0, kind: input, shape index: {}]   ;;  %s558_s1 = inlined_call_operand.vmem [shape: bf16[128,32], index: 1, kind: input, shape index: {}]   ;;  %s559_s2 = inlined_call_operand.vmem [shape: bf16[32,32], index: 2, kind: input, shape index: {}]   ;;  %s560_s4 = inlined_call_operand.vmem [shape: bf16[32,128], index: 4, kind: input, shape index: {}]   ;;  %s561_s3 = inlined_call_operand.vmem [shape: f32[1,32], index: 3, kind: input, shape index: {}]   ;;  %s562_s5 = inlined_call_operand.vmem [shape: f32[1,128], index: 5, kind: input, shape index: {}]   ;;  %s563_s6 = inlined_call_operand.vmem [shape: f32[8,128], index: 6, kind: output, shape index: {}]  }
   0x1   :  { %417 = vset.pattern.permute.xlu1 %v436_v0  ;;  %415 = vset.pattern.permute.xlu0 %v437_v1  ;;  %v24_v2 = vld [vmem:[%s557_s0] sm:$0xff]  ;;  %v425_v5 = vld [vmem:[%s558_s1 + $0x8] sm:$0xff]   ;;  %v440_v7 = vmov 1   ;;  %v426_v8 = vld [vmem:[%s558_s1 + $0x10] sm:$0xff]   ;;  %v441_v9 = vmov 4   ;;  %v442_v10 = vmov 5   ;;  %v25_v19 = vlaneseq }
   0x2   :  { %v424_v3 = vld [vmem:[%s558_s1] sm:$0xff]   ;;  %42 = vperm.xlu1 %417, %v24_v2   ;;  %28 = vperm.xlu0 %415, %v24_v2   ;;  %v427_v11 = vld [vmem:[%s558_s1 + $0x18] sm:$0xff]   ;;  %v443_v12 = vmov 6   ;;  %v444_v13 = vmov 7   ;;  %v429_v15 = vld [vmem:[%s558_s1 + $0x28] sm:$0xff]   ;;  %vm445_vm0 = vmmov 0  }
   0x3   :  { %369 = vmatprep.subr.bf16.mxu0 %v438_v4  ;;  %389 = vmatprep.subr.bf16.mxu1 %v438_v4  ;;  %v428_v14 = vld [vmem:[%s558_s1 + $0x20] sm:$0xff]   ;;  %v430_v16 = vld [vmem:[%s558_s1 + $0x30] sm:$0xff]   ;;  %v431_v17 = vld [vmem:[%s558_s1 + $0x38] sm:$0xff]   ;;  %v26_v22 = vand.u32 127, %v25_v19  ;;  %vm213_vm9 = vcmask 261120  }
   0x4   :  { %370 = vmatpush3.bf16.msra.mxu0 %v424_v3  ;;  %385 = vmatprep.mubr.msk.bf16.mxu0 %vm445_vm0, %v438_v4  ;;  %v432_v18 = vld [vmem:[%s559_s2] sm:$0xff]   ;;  %v433_v45 = vld [vmem:[%s559_s2 + $0x8] sm:$0xff]  }
   0x5   :  { %371 = vmatprep.subr.bf16.mxu0 %v438_v4  ;;  %393 = vmatprep.mubr.msk.bf16.mxu1 %vm445_vm0, %v438_v4  ;;  %v434_v50 = vld [vmem:[%s560_s4] sm:$0xff]   ;;  %v435_v53 = vld [vmem:[%s560_s4 + $0x8] sm:$0xff]  }
   0x6   :  { %418 = vset.pattern.permute.xlu1 %v439_v6  ;;  %416 = vset.pattern.permute.xlu0 %v440_v7  ;;  %v346_v54 = vld [vmem:[%s561_s3] ss:$0 sm:$0xff] }
   0x7   :  { %49 = vperm.xlu1 %418, %v24_v2   ;;  %35 = vperm.xlu0 %416, %v24_v2   ;;  %v350_v62 = vld [vmem:[%s562_s5] ss:$0 sm:$0xff] }
   0x8   :  { %372 = vmatpush3.bf16.msra.mxu0 %v425_v5  ;;  %390 = vmatpush3.bf16.msra.mxu1 %v432_v18 }
   0x9   :  { %373 = vmatprep.subr.bf16.mxu0 %v438_v4  ;;  %391 = vmatprep.subr.bf16.mxu1 %v438_v4 }
   0xb   :  { %419 = vset.pattern.permute.xlu1 %v441_v9  ;;  %420 = vset.pattern.permute.xlu0 %v442_v10 }
   0xc   :  { %56 = vperm.xlu1 %419, %v24_v2   ;;  %63 = vperm.xlu0 %420, %v24_v2  }
   0xd   :  { %374 = vmatpush3.bf16.msra.mxu0 %v426_v8  ;;  %392 = vmatpush3.bf16.msra.mxu1 %v433_v45 }
   0xe   :  { %375 = vmatprep.subr.bf16.mxu0 %v438_v4  ;;  %397 = vmatprep.subr.bf16.mxu1 %v438_v4 }
  0x10   :  { %421 = vset.pattern.permute.xlu1 %v443_v12  ;;  %423 = vset.pattern.permute.xlu0 %v444_v13 }
  0x11   :  { %70 = vperm.xlu1 %421, %v24_v2   ;;  %376 = vmatpush3.bf16.msra.mxu0 %v427_v11 }
  0x12   :  { %377 = vmatprep.subr.bf16.mxu0 %v438_v4 }
  0x15   :  { %422 = vset.pattern.permute.xlu1 %v444_v13  ;;  %378 = vmatpush3.bf16.msra.mxu0 %v428_v14 }
  0x16   :  { %77 = vperm.xlu1 %422, %v24_v2   ;;  %379 = vmatprep.subr.bf16.mxu0 %v438_v4 }
  0x19   :  { %380 = vmatpush3.bf16.msra.mxu0 %v429_v15 }
  0x1a   :  { %381 = vmatprep.subr.bf16.mxu0 %v438_v4 }
  0x1d   :  { %382 = vmatpush3.bf16.msra.mxu0 %v430_v16 }
  0x1e   :  { %383 = vmatprep.subr.bf16.mxu0 %v438_v4 }
  0x21   :  { %384 = vmatpush3.bf16.msra.mxu0 %v431_v17 }
  0x81   :  { %v43_v20 = vpop.permute.xlu1 %42  ;;  %v29_v21 = vpop.permute.xlu0 %28 }
  0x82   :  { %vm30_vm1 = vcmp.eq.s32.totalorder %v29_v21, %v26_v22  ;;  %vm44_vm2 = vcmp.eq.s32.totalorder %v43_v20, %v26_v22 }
  0x83   :  { %v330_v25 = vsel %vm30_vm1, 1.0, %v438_v4  ;;  %v332_v28 = vsel %vm44_vm2, 1.0, %v438_v4 }
  0x86   :  { %v50_v23 = vpop.permute.xlu1 %49  ;;  %v36_v24 = vpop.permute.xlu0 %35 }
  0x87   :  { %vm37_vm3 = vcmp.eq.s32.totalorder %v36_v24, %v26_v22  ;;  %vm51_vm4 = vcmp.eq.s32.totalorder %v50_v23, %v26_v22 }
  0x88   :  { %v331_v26 = vsel %vm37_vm3, 1.0, %v438_v4  ;;  %v333_v32 = vsel %vm51_vm4, 1.0, %v438_v4 }
  0x89   :  { %v40_v27 = vadd.f32 %v331_v26, %v330_v25 }
  0x8b   :  { %v47_v29 = vadd.f32 %v332_v28, %v40_v27  ;;  %v57_v30 = vpop.permute.xlu1 %56  ;;  %v64_v31 = vpop.permute.xlu0 %63 }
  0x8c   :  { %vm58_vm5 = vcmp.eq.s32.totalorder %v57_v30, %v26_v22  ;;  %vm65_vm6 = vcmp.eq.s32.totalorder %v64_v31, %v26_v22 }
  0x8d   :  { %v54_v33 = vadd.f32 %v333_v32, %v47_v29  ;;  %v334_v34 = vsel %vm58_vm5, 1.0, %v438_v4  ;;  %v335_v36 = vsel %vm65_vm6, 1.0, %v438_v4 }
  0x8f   :  { %v61_v35 = vadd.f32 %v334_v34, %v54_v33 }
  0x90   :  { %v71_v37 = vpop.permute.xlu1 %70 }
  0x91   :  { %vm72_vm7 = vcmp.eq.s32.totalorder %v71_v37, %v26_v22  ;;  %v68_v38 = vadd.f32 %v335_v36, %v61_v35 }
  0x92   :  { %v336_v39 = vsel %vm72_vm7, 1.0, %v438_v4 }
  0x93   :  { %v75_v41 = vadd.f32 %v336_v39, %v68_v38 }
  0x95   :  { %v78_v40 = vpop.permute.xlu1 %77 }
  0x96   :  { %vm79_vm8 = vcmp.eq.s32.totalorder %v78_v40, %v26_v22 }
  0x97   :  { %v337_v42 = vsel %vm79_vm8, 1.0, %v438_v4 }
  0x98   :  { %v82_v43 = vadd.f32 %v337_v42, %v75_v41 }
  0x9a   :  { %v83_v44 = vpack.c.bf16 %v82_v43, %v82_v43 }
  0x9c   :  { %386 = vmatmul.mubr.bf16.vlgmr.msra.gmra.mrb[0].mxu0 %v83_v44 }
 0x16f   :  { %v182_v46 = vpop.f32.mrb[0].mxu0 }
 0x170   :  { %v188_v47 = vmul.f32 0.125, %v182_v46  ;;  %v387_v48 = vpop.f32.mrb[1].mxu0 }
 0x171   :  { %v185_v49 = vpop.f32.mrb[2].mxu0 }
 0x172   :  { %v189_v51 = vpack.c.bf16 %v188_v47, %v188_v47  ;;  %v388_v52 = vpop.f32.mrb[3].mxu0 }
 0x174   :  { %394 = vmatmul.mubr.msk.bf16.vlgmr.msra.gmra.mrb[0].mxu1 %vm213_vm9, %v189_v51 }
 0x175   :  { %398 = vmatpush3.bf16.msra.mxu1 %v434_v50  ;;  %401 = vmatprep.mubr.msk.bf16.mxu1 %vm445_vm0, %v438_v4 }
 0x176   :  { %399 = vmatprep.subr.bf16.mxu1 %v438_v4 }
 0x179   :  { %400 = vmatpush3.bf16.msra.mxu1 %v435_v53 }
 0x247   :  { %v251_v55 = vpop.f32.mrb[0].mxu1 }
 0x248   :  { %v252_v56 = vadd.f32 %v346_v54, %v251_v55  ;;  %v395_v57 = vpop.f32.mrb[1].mxu1 }
 0x249   :  { %v254_v58 = vpop.f32.mrb[2].mxu1 }
 0x24a   :  { %v257_v59 = vmax.f32 %v252_v56, 0.0  ;;  %v396_v60 = vpop.f32.mrb[3].mxu1 }
 0x24c   :  { %v258_v61 = vpack.c.bf16 %v257_v59, %v257_v59 }
 0x24e   :  { %402 = vmatmul.mubr.msk.bf16.vlgmr.msra.gmra.mrb[4].mxu1 %vm213_vm9, %v258_v61 }
 0x321   :  { %v319_v63 = vpop.f32.mrb[4].mxu1 }
 0x322   :  { %v320_v0 = vadd.f32 %v350_v62, %v319_v63  ;;  %v403_v1 = vpop.f32.mrb[5].mxu1 }
 0x323   :  { %v322_v2 = vpop.f32.mrb[6].mxu1 }
 0x324   :  { %325 = vst [vmem:[%s563_s6] sm:$0xff] %v320_v0  ;;  %v404_v3 = vpop.f32.mrb[7].mxu1 }

</bundles_post_ra>
